<compile_context>
chip_gen: v6e
topology: v6e:2x2x1
jax: 0.10.0
libtpu: 0.0.40
codegen_flags: <defaults>
</compile_context>

<pallas_src>
import jax
import jax.numpy as jnp
from jax.experimental import pallas as pl
from jax.experimental.pallas import tpu as pltpu

_LANE = 128                              # lane width (covers sublane packing too)
_MIN_VMEM_BYTES = 8 * 1024 * 1024        # floor for the scoped-VMEM request
_VMEM_LIMIT_CAP = 48 * 1024 * 1024       # safe on v5e/v6e (128 MiB) and v7x (64 MiB)
_SMALL_BYTES = 256 * 1024                # per-batch size below which XLA wins


def _transpose_kernel(x_ref, o_ref):
    # x_ref: (TS, TH)  ->  o_ref: (TH, TS)   (batch dim squeezed away).
    # Lowers onto the XLU transpose path; stays hidden under the DMA on
    # v5e/v6e, may become co-critical only on v7x.
    o_ref[...] = x_ref[...].T


def _pick_tile(dim: int, pref: int) -> int:
    """Tile edge: multiple of 128, <= pref, <= dim.

    The grid uses pl.cdiv, so the tile does NOT need to divide `dim`; the last
    block along the axis is simply masked."""
    if dim <= _LANE:
        return dim  # full extent (< 128) is always a legal block dim
    t = min(pref, dim)
    return max(_LANE, t - (t % _LANE))


def _vmem_limit_bytes(tile_bytes: int) -> int:
    cap = _VMEM_LIMIT_CAP
    try:  # derive from hardware when the query is available
        cap = min(cap, int(pltpu.get_tpu_info().vmem_capacity_bytes * 3) // 4)
    except Exception:
        pass
    # 2x double-buffered input + 2x output is 4*tile; 8x gives headroom.
    return int(min(max(8 * tile_bytes, _MIN_VMEM_BYTES), cap))


def _transpose_call(x: jax.Array, ts: int, th: int) -> jax.Array:
    B, S, H = x.shape
    itemsize = jnp.dtype(x.dtype).itemsize
    gs = pl.cdiv(S, ts)
    gh = pl.cdiv(H, th)
    tile_bytes = ts * th * itemsize

    in_block = (pl.Squeezed(), ts, th)
    out_block = (pl.Squeezed(), th, ts)

    if B >= 2:
        # Leading batch axis shards cleanly across TCs; innermost axis walks
        # the output's contiguous S direction for write locality.
        grid = (B, gh, gs)
        in_map = lambda b, h, s: (b, s, h)
        out_map = lambda b, h, s: (b, h, s)
        sem = ("parallel", "parallel", "parallel")
    else:
        # B == 1: drop the batch axis so the leading "parallel" axis has
        # extent >= 2 and both TensorCores get work on v7x.
        grid = (gh, gs)
        in_map = lambda h, s: (0, s, h)
        out_map = lambda h, s: (0, h, s)
        sem = ("parallel", "parallel")

    return pl.pallas_call(
        _transpose_kernel,
        out_shape=jax.ShapeDtypeStruct((B, H, S), x.dtype),
        grid=grid,
        in_specs=[pl.BlockSpec(in_block, in_map)],
        out_specs=pl.BlockSpec(out_block, out_map),
        compiler_params=pltpu.CompilerParams(
            dimension_semantics=sem,
            vmem_limit_bytes=_vmem_limit_bytes(tile_bytes),
        ),
    )(x)


def transpose_1_2(x: jax.Array) -> jax.Array:
    """Pallas equivalent of torch.Tensor.transpose(1, 2)."""
    if x.ndim != 3:
        # Module semantics for other ranks: plain axis swap.
        return jnp.swapaxes(x, 1, 2)

    B, S, H = x.shape
    itemsize = jnp.dtype(x.dtype).itemsize

    # Small-shape fast path: lane dims < 128 force heavily masked stores and
    # pallas_call / grid-step overhead dominates — XLA's transpose wins.
    if S < _LANE or H < _LANE or S * H * itemsize < _SMALL_BYTES:
        return jnp.swapaxes(x, 1, 2)

    # Dtype-aware tiles: >= 2 KiB contiguous runs on the (strided) output
    # writeback, >= 1 KiB on the input reads.
    pref_ts = max(_LANE, 2048 // itemsize)   # f32: 512, bf16: 1024, int8: 2048
    pref_th = max(_LANE, 1024 // itemsize)   # f32: 256, bf16: 512,  int8: 1024
    ts = _pick_tile(S, pref_ts)
    th = _pick_tile(H, pref_th)

    return _transpose_call(x, ts, th)


if __name__ == "__main__":
    # Small shape consistent with the module (batch=2, seq=8, hidden=32);
    # exercises the small-shape fast path.
    x = jax.random.normal(jax.random.PRNGKey(0), (2, 8, 32), dtype=jnp.float32)
    y = jax.block_until_ready(transpose_1_2(x))
    ref = jnp.transpose(x, (0, 2, 1))
    assert y.shape == ref.shape, (y.shape, ref.shape)
    assert jnp.array_equal(y, ref), "mismatch vs reference transpose (small)"

    # 128-aligned tiled Pallas path (B >= 2 grid branch).
    x2 = jax.random.normal(jax.random.PRNGKey(1), (2, 256, 384), dtype=jnp.float32)
    y2 = jax.block_until_ready(transpose_1_2(x2))
    assert jnp.array_equal(y2, jnp.transpose(x2, (0, 2, 1))), "mismatch (tiled)"

    # Ragged shape: cdiv grid with masked edge blocks in both S and H.
    x3 = jax.random.normal(jax.random.PRNGKey(2), (2, 392, 264), dtype=jnp.float32)
    y3 = jax.block_until_ready(transpose_1_2(x3))
    assert jnp.array_equal(y3, jnp.transpose(x3, (0, 2, 1))), "mismatch (ragged)"

    # B == 1 grid branch (batch axis dropped for megacore sharding).
    x4 = jax.random.normal(jax.random.PRNGKey(3), (1, 256, 384), dtype=jnp.float32)
    y4 = jax.block_until_ready(transpose_1_2(x4))
    assert jnp.array_equal(y4, jnp.transpose(x4, (0, 2, 1))), "mismatch (B=1)"

    print("KERNEL_OK")
</pallas_src>

<mosaic_0001>
module attributes {stable_mosaic.version = 11 : i64} {
  func.func @_transpose_kernel(%arg0: i32, %arg1: i32, %arg2: i32, %arg3: memref<1x256x256xf32, #tpu.memory_space<vmem>>, %arg4: memref<1x256x256xf32, #tpu.memory_space<vmem>>) attributes {dimension_semantics = [#tpu.dimension_semantics<parallel>, #tpu.dimension_semantics<parallel>, #tpu.dimension_semantics<parallel>], iteration_bounds = array<i64: 2, 2, 1>, scalar_prefetch = 0 : i64, scratch_operands = 0 : i64, tpu.core_type = #tpu.core_type<tc>, window_params = [{transform_indices = @transform_0, window_bounds = array<i64: 1, 256, 256>}, {transform_indices = @transform_1, window_bounds = array<i64: 1, 256, 256>}]} {
    %c0 = arith.constant 0 : index
    %c0_0 = arith.constant 0 : index
    %c0_1 = arith.constant 0 : index
    %0 = vector.load %arg3[%c0, %c0_0, %c0_1] : memref<1x256x256xf32, #tpu.memory_space<vmem>>, vector<1x256x256xf32>
    %1 = vector.shape_cast %0 : vector<1x256x256xf32> to vector<256x256xf32>
    %2 = tpu.transpose %1, [1, 0] : vector<256x256xf32> -> vector<256x256xf32>
    %c0_2 = arith.constant 0 : index
    %c0_3 = arith.constant 0 : index
    %c0_4 = arith.constant 0 : index
    %3 = vector.load %arg4[%c0_2, %c0_3, %c0_4] : memref<1x256x256xf32, #tpu.memory_space<vmem>>, vector<1x256x256xf32>
    %4 = vector.shape_cast %3 : vector<1x256x256xf32> to vector<256x256xf32>
    %5 = vector.shape_cast %2 : vector<256x256xf32> to vector<1x256x256xf32>
    tpu.vector_store %arg4[%c0_2, %c0_3, %c0_4], %5 {strides = array<i32>} : memref<1x256x256xf32, #tpu.memory_space<vmem>>, vector<1x256x256xf32>,
    return
  }
  func.func @transform_0(%arg0: i32, %arg1: i32, %arg2: i32) -> (i32, i32, i32) {
    %c0_i32 = arith.constant 0 : i32
    return %arg0, %arg2, %arg1 : i32, i32, i32
  }
  func.func @transform_1(%arg0: i32, %arg1: i32, %arg2: i32) -> (i32, i32, i32) {
    %c0_i32 = arith.constant 0 : i32
    return %arg0, %arg1, %arg2 : i32, i32, i32
  }
}

</mosaic_0001>

<bundles_post_ra>
// kernel: tpu_custom_call.1
= control target key start
LH: loop header
LB: loop body
LE: loop exit
PB: predicated region body
PF: predicated region fallthrough
CT: control target
= control target key end

     0   :  { %6 = vsyncpa [#allocation3], 0  ;;  %s1138_s0 = inlined_call_operand.hbm [shape: f32[2,256,384], index: 0, kind: input, shape index: {}]   ;;  %s1139_s1 = inlined_call_operand.hbm [shape: f32[2,384,256], index: 1, kind: output, shape index: {}]  }
   0x1   :  { %8 = vsyncpa [#allocation3 + $0x1], 0 }
   0x2   :  { %9 = vsyncpa [#allocation4], 0 }
   0x3   :  { %11 = vsyncpa [#allocation4 + $0x1], 0  ;;  %s813_s6 = smov 0   ;;  %s815_s7 = smov 0  }
   0x4   :  { %s817_s8 = smov 0   ;;  %s819_s9 = smov 0  }
   0x5   :  { %s821_s10 = smov 0   ;;  %s823_s11 = smov 0  }
   0x6   :  { %s825_s12 = smov 0   ;;  %s827_s13 = smov 0  }
   0x7 LB: > { %s566_s14 = sadd.s32 4294967295, %s795_s13   ;;  %s567_s15 = sadd.s32 4294967294, %s795_s13   ;;  %s795_s13 = sphi %s827_s13, %s17_s13   ;;  %s791_s12 = sphi %s825_s12, %s1156_s12   ;;  %s787_s11 = sphi %s823_s11, %s1155_s11   ;;  %s783_s10 = sphi %s821_s10, %s1154_s10   ;;  %s779_s9 = sphi %s819_s9, %s1153_s9   ;;  %s775_s8 = sphi %s817_s8, %s1152_s8   ;;  %s771_s7 = sphi %s815_s7, %s1151_s7   ;;  %s767_s6 = sphi %s813_s6, %s1150_s6  }
   0x8   : > { %s32_s16 = sadd.s32 1, %s787_s11  ;;  %s36_s17 = sadd.s32 1, %s791_s12 }
   0x9   : > { %p34_p0 = scmp.ge.s32.totalorder %s32_s16, 2  ;;  %p54_p1 = scmp.ne.s32.totalorder %s775_s8, %s771_s7 }
   0xa   : > { %p55_p2 = scmp.eq.s32.totalorder %s795_s13, 0  ;;  %p60_p5 = scmp.ne.s32.totalorder %s771_s7, %s767_s6 }
   0xb   : > { %s1158_s16 = smov (%p34_p0, %s32_s16), 0  ;;  %s1160_s17 = smov (!%p34_p0, %s36_s17), %s791_s12 }
   0xc   : > { %1142 = sst [smem:[#allocation8_spill]] %s1158_s16  ;;  %s43_s18 = ssub.s32 %s787_s11, %s1158_s16 }
   0xd   : > { %p865_p3 = por %p55_p2, %p54_p1  ;;  %p38_p4 = scmp.ge.s32.totalorder %s1160_s17, 2 }
   0xe   : > { %p61_p6 = scmp.eq.s32.totalorder %s566_s14, 0  ;;  %p88_p7 = scmp.eq.s32.totalorder %s566_s14, 3 }
   0xf   : > { %s1162_s17 = smov (%p38_p4, %s1160_s17), 0  ;;  %p94_p10 = scmp.eq.s32.totalorder %s567_s15, 3 }
  0x10   : > { %1144 = sst [smem:[#allocation9_spill]] %s1162_s17  ;;  %p873_p8 = por %p61_p6, %p60_p5 }
  0x11   : > { %p877_p9 = por %p88_p7, %p54_p1  ;;  %s40_s22 = ssub.s32 %s791_s12, %s1162_s17 }
  0x12   : > { %s44_s23 = sor.u32 %s43_s18, %s40_s22  ;;  %s47_s24 = sadd.s32 1, %s775_s8 }
  0x13   : > { %p45_p11 = scmp.eq.s32.totalorder %s44_s23, 0  ;;  %p884_p12 = por %p94_p10, %p60_p5 }
  0x14   : > { %p569_p13 = scmp.ge.s32.totalorder %s795_s13, 4 }
  0x15   : > { %s889_s26 = scalar_select %p45_p11, %s775_s8, %s47_s24  }
  0x16   : > { %110 = sbr.rel (%p569_p13) target bundleno = 51 (0x33), region = 16 }
  0x1b   : > { %113 = sbr.rel (!%p865_p3) target bundleno = 51 (0x33), region = 20  ;;  %s114_s27 = sand.u32 (%p865_p3), 1, %s775_s8  }
  0x1c   : > { %s571_s28 = sshll.u32 (%p865_p3), %s787_s11, 1  ;;  %s570_s29 = sshll.u32 (%p865_p3), %s114_s27, 9 }
  0x1d   : > { %s121_s30 = ssub.s32 (%p865_p3), 3, %s571_s28  ;;  %s902_s4 = scalar_lea.sflag (%p865_p3), [#allocation3], %s114_s27 }
  0x1e   : > { %p122_p0 = scmp.lt.s32.totalorder (%p865_p3), %s121_s30, 2  ;;  %s118_s5 = scalar_lea.vmem (%p865_p3), [#allocation2], %s570_s29 }
  0x20   : > { %s1164_s30 = smov (!%p122_p0, %s121_s30), 2 }
  0x21   : > { %s899_s2 = sshll.u32 %s1164_s30, 12 }
  0x22   : > { %s126_s3 = ssub.s32 8192, %s899_s2 }
  0x23   : > { %127 = vsyncadd %s902_s4, %s126_s3  ;;  %p573_p1 = scmp.ne.s32.totalorder %s899_s2, 0  ;;  %s596_s14 = smul.u32 96, %s791_s12 }
  0x24   : > { %s575_s15 = sshll.u32 %s1164_s30, 3  ;;  %s137_s18 = sshll.u32 %s118_s5, 4  ;;  %s138_s18 = int_to_ptr.vmem [resolvable:$true] %s137_s18 }
  0x25   : > { %s132_s19 = sadd.s32 %s596_s14, %s571_s28  ;;  %s685_s17 = scalar_lea.vmem %s138_s18, %s899_s2 }
  0x26   : > { %s574_s22 = sshll.u32 %s132_s19, 7  ;;  %p686_p2 = scmp.ne.s32.totalorder %s138_s18, %s685_s17 }
  0x27   : > { %s134_s27 = scalar_lea.hbm %s1138_s0, %s574_s22  ;;  %s797_s29 = smov [#allocation2]  }
  0x28   : > { %p687_p3 = pnand %p686_p2, %p573_p1  ;;  %s689_s3 = sshll.u32 %s797_s29, 4  ;;  %s690_s3 = int_to_ptr.vmem [resolvable:$false] %s689_s3 }
  0x29   : > { %s691_s16 = scalar_lea.vmem %s690_s3, 16384  ;;  %p692_p5 = scmp.lt.s32.totalorder %s138_s18, %s690_s3 }
  0x2a   : > { %p688_p4 = pneg %p687_p3  ;;  %p693_p6 = scmp.lt.s32.totalorder %s691_s16, %s685_s17 }
  0x2c   : > { %p694_p7 = por %p693_p6, %p692_p5 }
  0x2e   : > { %p695_p10 = pnand %p694_p7, %p688_p4 }
  0x30   : > { %698 = shalt.err (!%p695_p10)
}
  0x31   : > { %s798_s28 = smov 384   ;;  %s799_s30 = smov 256  }
  0x32   : > { %143 = dma.hbm_to_vmem [thread:$0]  (%p573_p1), %s134_s27, %s899_s2, %s138_s18, %s902_s4, %s798_s28, %s799_s30, %s575_s15  }
  0x33 PF: > { %p578_p11 = scmp.ge.s32.totalorder %s795_s13, 1  ;;  %p145_p13 = scmp.lt.s32.totalorder %s795_s13, 5 }
  0x35   : > { %p146_p0 = pnand %p578_p11, %p145_p13 }
  0x36   : > { %s921_s16 = sand.u32 (!%p146_p0), 1, %s771_s7  }
  0x37   : > { %149 = sbr.rel (%p146_p0) target bundleno = 341 (0x155), region = 24  ;;  %s579_s17 = sshll.u32 (!%p146_p0), %s921_s16, 9 }
  0x38   : > { %s152_s5 = scalar_lea.sflag (!%p146_p0), [#allocation3], %s921_s16  ;;  %s927_s14 = scalar_lea.vmem (!%p146_p0), [#allocation2], %s579_s17 }
  0x3c   : > { %758 = dma.done.wait (%p873_p8), %s152_s5, 8192  }
  0x3d   : > { %760 = vsyncadd (%p873_p8), %s152_s5, 4294959104  ;;  %v188_v0 = vld [vmem:[%s927_s14 + $0x8] sm:$0xff]  ;;  %v187_v1 = vld [vmem:[%s927_s14] sm:$0xff]  ;;  %s999_s20 = scalar_lea.vmem [#allocation5], %s579_s17  ;;  %s444_s2 = scalar_lea.sflag [#allocation4], %s921_s16 }
  0x3e   : > { %283 = vxpose.xlu1.b32.start [1/16] %v188_v0, 128  ;;  %251 = vxpose.xlu0.b32.start [1/16] %v187_v1, 128  ;;  %v190_v2 = vld [vmem:[%s927_s14 + $0x18] sm:$0xff]  ;;  %v189_v3 = vld [vmem:[%s927_s14 + $0x10] sm:$0xff]  ;;  %v192_v4 = vld [vmem:[%s927_s14 + $0x28] sm:$0xff]  ;;  %s582_s4 = sshll.u32 (%p877_p9), %s779_s9, 5 }
  0x3f   : > { %v191_v5 = vld [vmem:[%s927_s14 + $0x20] sm:$0xff]  ;;  %v194_v6 = vld [vmem:[%s927_s14 + $0x38] sm:$0xff]  ;;  %v193_v7 = vld [vmem:[%s927_s14 + $0x30] sm:$0xff]  ;;  %s453_s15 = ssub.s32 (%p877_p9), 48, %s582_s4 }
  0x40   : > { %v196_v8 = vld [vmem:[%s927_s14 + $0x48] sm:$0xff]  ;;  %v195_v9 = vld [vmem:[%s927_s14 + $0x40] sm:$0xff]  ;;  %v198_v10 = vld [vmem:[%s927_s14 + $0x58] sm:$0xff]  ;;  %p454_p8 = scmp.lt.s32.totalorder (%p877_p9), %s453_s15, 32 }
  0x41   : > { %v197_v11 = vld [vmem:[%s927_s14 + $0x50] sm:$0xff]  ;;  %v200_v12 = vld [vmem:[%s927_s14 + $0x68] sm:$0xff]  ;;  %v199_v13 = vld [vmem:[%s927_s14 + $0x60] sm:$0xff] }
  0x42   : > { %284 = vxpose.xlu1.b32.cont [2/16] %v190_v2, 128  ;;  %252 = vxpose.xlu0.b32.cont [2/16] %v189_v3, 128  ;;  %v202_v14 = vld [vmem:[%s927_s14 + $0x78] sm:$0xff]  ;;  %v201_v15 = vld [vmem:[%s927_s14 + $0x70] sm:$0xff]  ;;  %v204_v16 = vld [vmem:[%s927_s14 + $0x88] sm:$0xff] }
  0x43   : > { %v203_v17 = vld [vmem:[%s927_s14 + $0x80] sm:$0xff]  ;;  %v206_v18 = vld [vmem:[%s927_s14 + $0x98] sm:$0xff]  ;;  %v205_v19 = vld [vmem:[%s927_s14 + $0x90] sm:$0xff] }
  0x44   : > { %v208_v20 = vld [vmem:[%s927_s14 + $0xa8] sm:$0xff]  ;;  %v207_v21 = vld [vmem:[%s927_s14 + $0xa0] sm:$0xff]  ;;  %v210_v22 = vld [vmem:[%s927_s14 + $0xb8] sm:$0xff] }
  0x45   : > { %v209_v23 = vld [vmem:[%s927_s14 + $0xb0] sm:$0xff]  ;;  %v212_v24 = vld [vmem:[%s927_s14 + $0xc8] sm:$0xff]  ;;  %v211_v25 = vld [vmem:[%s927_s14 + $0xc0] sm:$0xff] }
  0x46   : > { %285 = vxpose.xlu1.b32.cont [3/16] %v192_v4, 128  ;;  %253 = vxpose.xlu0.b32.cont [3/16] %v191_v5, 128  ;;  %v214_v26 = vld [vmem:[%s927_s14 + $0xd8] sm:$0xff]  ;;  %v213_v27 = vld [vmem:[%s927_s14 + $0xd0] sm:$0xff]  ;;  %v216_v28 = vld [vmem:[%s927_s14 + $0xe8] sm:$0xff] }
  0x47   : > { %v215_v29 = vld [vmem:[%s927_s14 + $0xe0] sm:$0xff]  ;;  %v218_v30 = vld [vmem:[%s927_s14 + $0xf8] sm:$0xff]  ;;  %v217_v31 = vld [vmem:[%s927_s14 + $0xf0] sm:$0xff] }
  0x48   : > { %v220_v32 = vld [vmem:[%s927_s14 + $0x108] sm:$0xff]  ;;  %v219_v33 = vld [vmem:[%s927_s14 + $0x100] sm:$0xff]  ;;  %v222_v34 = vld [vmem:[%s927_s14 + $0x118] sm:$0xff] }
  0x49   : > { %v221_v35 = vld [vmem:[%s927_s14 + $0x110] sm:$0xff]  ;;  %v224_v36 = vld [vmem:[%s927_s14 + $0x128] sm:$0xff]  ;;  %v223_v37 = vld [vmem:[%s927_s14 + $0x120] sm:$0xff] }
  0x4a   : > { %286 = vxpose.xlu1.b32.cont [4/16] %v194_v6, 128  ;;  %254 = vxpose.xlu0.b32.cont [4/16] %v193_v7, 128  ;;  %v226_v38 = vld [vmem:[%s927_s14 + $0x138] sm:$0xff]  ;;  %v225_v39 = vld [vmem:[%s927_s14 + $0x130] sm:$0xff]  ;;  %v228_v40 = vld [vmem:[%s927_s14 + $0x148] sm:$0xff] }
  0x4b   : > { %v227_v41 = vld [vmem:[%s927_s14 + $0x140] sm:$0xff]  ;;  %v230_v42 = vld [vmem:[%s927_s14 + $0x158] sm:$0xff]  ;;  %v229_v43 = vld [vmem:[%s927_s14 + $0x150] sm:$0xff] }
  0x4c   : > { %v232_v44 = vld [vmem:[%s927_s14 + $0x168] sm:$0xff]  ;;  %v231_v45 = vld [vmem:[%s927_s14 + $0x160] sm:$0xff]  ;;  %v234_v46 = vld [vmem:[%s927_s14 + $0x178] sm:$0xff] }
  0x4d   : > { %v233_v47 = vld [vmem:[%s927_s14 + $0x170] sm:$0xff]  ;;  %v236_v48 = vld [vmem:[%s927_s14 + $0x188] sm:$0xff]  ;;  %v235_v49 = vld [vmem:[%s927_s14 + $0x180] sm:$0xff] }
  0x4e   : > { %287 = vxpose.xlu1.b32.cont [5/16] %v196_v8, 128  ;;  %255 = vxpose.xlu0.b32.cont [5/16] %v195_v9, 128  ;;  %v238_v50 = vld [vmem:[%s927_s14 + $0x198] sm:$0xff]  ;;  %v237_v51 = vld [vmem:[%s927_s14 + $0x190] sm:$0xff]  ;;  %v240_v52 = vld [vmem:[%s927_s14 + $0x1a8] sm:$0xff] }
  0x4f   : > { %v239_v53 = vld [vmem:[%s927_s14 + $0x1a0] sm:$0xff]  ;;  %v242_v54 = vld [vmem:[%s927_s14 + $0x1b8] sm:$0xff]  ;;  %v241_v55 = vld [vmem:[%s927_s14 + $0x1b0] sm:$0xff] }
  0x50   : > { %v244_v56 = vld [vmem:[%s927_s14 + $0x1c8] sm:$0xff]  ;;  %v243_v57 = vld [vmem:[%s927_s14 + $0x1c0] sm:$0xff]  ;;  %v246_v58 = vld [vmem:[%s927_s14 + $0x1d8] sm:$0xff] }
  0x51   : > { %v245_v59 = vld [vmem:[%s927_s14 + $0x1d0] sm:$0xff]  ;;  %v248_v60 = vld [vmem:[%s927_s14 + $0x1e8] sm:$0xff]  ;;  %v247_v61 = vld [vmem:[%s927_s14 + $0x1e0] sm:$0xff] }
  0x52   : > { %288 = vxpose.xlu1.b32.cont [6/16] %v198_v10, 128  ;;  %256 = vxpose.xlu0.b32.cont [6/16] %v197_v11, 128  ;;  %v250_v62 = vld [vmem:[%s927_s14 + $0x1f8] sm:$0xff]  ;;  %v249_v63 = vld [vmem:[%s927_s14 + $0x1f0] sm:$0xff] }
  0x56   : > { %289 = vxpose.xlu1.b32.cont [7/16] %v200_v12, 128  ;;  %257 = vxpose.xlu0.b32.cont [7/16] %v199_v13, 128 }
  0x5a   : > { %290 = vxpose.xlu1.b32.cont [8/16] %v202_v14, 128  ;;  %258 = vxpose.xlu0.b32.cont [8/16] %v201_v15, 128 }
  0x5e   : > { %291 = vxpose.xlu1.b32.cont [9/16] %v204_v16, 128  ;;  %259 = vxpose.xlu0.b32.cont [9/16] %v203_v17, 128 }
  0x62   : > { %292 = vxpose.xlu1.b32.cont [10/16] %v206_v18, 128  ;;  %260 = vxpose.xlu0.b32.cont [10/16] %v205_v19, 128 }
  0x66   : > { %293 = vxpose.xlu1.b32.cont [11/16] %v208_v20, 128  ;;  %261 = vxpose.xlu0.b32.cont [11/16] %v207_v21, 128 }
  0x6a   : > { %294 = vxpose.xlu1.b32.cont [12/16] %v210_v22, 128  ;;  %262 = vxpose.xlu0.b32.cont [12/16] %v209_v23, 128 }
  0x6e   : > { %295 = vxpose.xlu1.b32.cont [13/16] %v212_v24, 128  ;;  %263 = vxpose.xlu0.b32.cont [13/16] %v211_v25, 128 }
  0x72   : > { %296 = vxpose.xlu1.b32.cont [14/16] %v214_v26, 128  ;;  %264 = vxpose.xlu0.b32.cont [14/16] %v213_v27, 128 }
  0x76   : > { %297 = vxpose.xlu1.b32.cont [15/16] %v216_v28, 128  ;;  %265 = vxpose.xlu0.b32.cont [15/16] %v215_v29, 128 }
  0x7a   : > { %298 = vxpose.xlu1.b32.end [16/16] %v218_v30, 128  ;;  %266 = vxpose.xlu0.b32.end [16/16] %v217_v31, 128 }
  0x7e   : > { %347 = vxpose.xlu1.b32.start [1/16] %v220_v32, 128  ;;  %315 = vxpose.xlu0.b32.start [1/16] %v219_v33, 128 }
  0x82   : > { %348 = vxpose.xlu1.b32.cont [2/16] %v222_v34, 128  ;;  %316 = vxpose.xlu0.b32.cont [2/16] %v221_v35, 128 }
  0x86   : > { %349 = vxpose.xlu1.b32.cont [3/16] %v224_v36, 128  ;;  %317 = vxpose.xlu0.b32.cont [3/16] %v223_v37, 128 }
  0x8a   : > { %350 = vxpose.xlu1.b32.cont [4/16] %v226_v38, 128  ;;  %318 = vxpose.xlu0.b32.cont [4/16] %v225_v39, 128 }
  0x8e   : > { %351 = vxpose.xlu1.b32.cont [5/16] %v228_v40, 128  ;;  %319 = vxpose.xlu0.b32.cont [5/16] %v227_v41, 128 }
  0x92   : > { %352 = vxpose.xlu1.b32.cont [6/16] %v230_v42, 128  ;;  %320 = vxpose.xlu0.b32.cont [6/16] %v229_v43, 128 }
  0x96   : > { %353 = vxpose.xlu1.b32.cont [7/16] %v232_v44, 128  ;;  %321 = vxpose.xlu0.b32.cont [7/16] %v231_v45, 128 }
  0x9a   : > { %354 = vxpose.xlu1.b32.cont [8/16] %v234_v46, 128  ;;  %322 = vxpose.xlu0.b32.cont [8/16] %v233_v47, 128 }
  0x9e   : > { %355 = vxpose.xlu1.b32.cont [9/16] %v236_v48, 128  ;;  %323 = vxpose.xlu0.b32.cont [9/16] %v235_v49, 128 }
  0xa2   : > { %356 = vxpose.xlu1.b32.cont [10/16] %v238_v50, 128  ;;  %324 = vxpose.xlu0.b32.cont [10/16] %v237_v51, 128 }
  0xa6   : > { %357 = vxpose.xlu1.b32.cont [11/16] %v240_v52, 128  ;;  %325 = vxpose.xlu0.b32.cont [11/16] %v239_v53, 128 }
  0xaa   : > { %358 = vxpose.xlu1.b32.cont [12/16] %v242_v54, 128  ;;  %326 = vxpose.xlu0.b32.cont [12/16] %v241_v55, 128 }
  0xae   : > { %359 = vxpose.xlu1.b32.cont [13/16] %v244_v56, 128  ;;  %327 = vxpose.xlu0.b32.cont [13/16] %v243_v57, 128 }
  0xb2   : > { %360 = vxpose.xlu1.b32.cont [14/16] %v246_v58, 128  ;;  %328 = vxpose.xlu0.b32.cont [14/16] %v245_v59, 128 }
  0xb6   : > { %361 = vxpose.xlu1.b32.cont [15/16] %v248_v60, 128  ;;  %329 = vxpose.xlu0.b32.cont [15/16] %v247_v61, 128 }
  0xba   : > { %362 = vxpose.xlu1.b32.end [16/16] %v250_v62, 128  ;;  %v299_v0 = vpop.trf.xlu1  ;;  %330 = vxpose.xlu0.b32.end [16/16] %v249_v63, 128  ;;  %v267_v1 = vpop.trf.xlu0 }
  0xbb   : > { %411 = vst [vmem:[%s999_s20 + $0x100] sm:$0xff] %v299_v0  ;;  %379 = vst [vmem:[%s999_s20] sm:$0xff] %v267_v1 }
  0xbe   : > { %v300_v2 = vpop.trf.xlu1  ;;  %v268_v3 = vpop.trf.xlu0 }
  0xbf   : > { %413 = vst [vmem:[%s999_s20 + $0x110] sm:$0xff] %v300_v2  ;;  %381 = vst [vmem:[%s999_s20 + $0x10] sm:$0xff] %v268_v3 }
  0xc2   : > { %v301_v4 = vpop.trf.xlu1  ;;  %v269_v5 = vpop.trf.xlu0 }
  0xc3   : > { %415 = vst [vmem:[%s999_s20 + $0x120] sm:$0xff] %v301_v4  ;;  %383 = vst [vmem:[%s999_s20 + $0x20] sm:$0xff] %v269_v5 }
  0xc6   : > { %v302_v6 = vpop.trf.xlu1  ;;  %v270_v7 = vpop.trf.xlu0 }
  0xc7   : > { %417 = vst [vmem:[%s999_s20 + $0x130] sm:$0xff] %v302_v6  ;;  %385 = vst [vmem:[%s999_s20 + $0x30] sm:$0xff] %v270_v7 }
  0xca   : > { %v303_v8 = vpop.trf.xlu1  ;;  %v271_v9 = vpop.trf.xlu0 }
  0xcb   : > { %419 = vst [vmem:[%s999_s20 + $0x140] sm:$0xff] %v303_v8  ;;  %387 = vst [vmem:[%s999_s20 + $0x40] sm:$0xff] %v271_v9 }
  0xce   : > { %v304_v10 = vpop.trf.xlu1  ;;  %v272_v11 = vpop.trf.xlu0 }
  0xcf   : > { %421 = vst [vmem:[%s999_s20 + $0x150] sm:$0xff] %v304_v10  ;;  %389 = vst [vmem:[%s999_s20 + $0x50] sm:$0xff] %v272_v11 }
  0xd2   : > { %v305_v12 = vpop.trf.xlu1  ;;  %v273_v13 = vpop.trf.xlu0 }
  0xd3   : > { %423 = vst [vmem:[%s999_s20 + $0x160] sm:$0xff] %v305_v12  ;;  %391 = vst [vmem:[%s999_s20 + $0x60] sm:$0xff] %v273_v13 }
  0xd6   : > { %v306_v14 = vpop.trf.xlu1  ;;  %v274_v15 = vpop.trf.xlu0 }
  0xd7   : > { %425 = vst [vmem:[%s999_s20 + $0x170] sm:$0xff] %v306_v14  ;;  %393 = vst [vmem:[%s999_s20 + $0x70] sm:$0xff] %v274_v15 }
  0xda   : > { %v307_v16 = vpop.trf.xlu1  ;;  %v275_v17 = vpop.trf.xlu0 }
  0xdb   : > { %427 = vst [vmem:[%s999_s20 + $0x180] sm:$0xff] %v307_v16  ;;  %395 = vst [vmem:[%s999_s20 + $0x80] sm:$0xff] %v275_v17 }
  0xde   : > { %v308_v18 = vpop.trf.xlu1  ;;  %v276_v19 = vpop.trf.xlu0 }
  0xdf   : > { %429 = vst [vmem:[%s999_s20 + $0x190] sm:$0xff] %v308_v18  ;;  %397 = vst [vmem:[%s999_s20 + $0x90] sm:$0xff] %v276_v19 }
  0xe2   : > { %v309_v20 = vpop.trf.xlu1  ;;  %v277_v21 = vpop.trf.xlu0 }
  0xe3   : > { %431 = vst [vmem:[%s999_s20 + $0x1a0] sm:$0xff] %v309_v20  ;;  %399 = vst [vmem:[%s999_s20 + $0xa0] sm:$0xff] %v277_v21 }
  0xe6   : > { %v310_v22 = vpop.trf.xlu1  ;;  %v278_v23 = vpop.trf.xlu0 }
  0xe7   : > { %433 = vst [vmem:[%s999_s20 + $0x1b0] sm:$0xff] %v310_v22  ;;  %401 = vst [vmem:[%s999_s20 + $0xb0] sm:$0xff] %v278_v23 }
  0xea   : > { %v311_v24 = vpop.trf.xlu1  ;;  %v279_v25 = vpop.trf.xlu0 }
  0xeb   : > { %435 = vst [vmem:[%s999_s20 + $0x1c0] sm:$0xff] %v311_v24  ;;  %403 = vst [vmem:[%s999_s20 + $0xc0] sm:$0xff] %v279_v25 }
  0xee   : > { %v312_v26 = vpop.trf.xlu1  ;;  %v280_v27 = vpop.trf.xlu0 }
  0xef   : > { %437 = vst [vmem:[%s999_s20 + $0x1d0] sm:$0xff] %v312_v26  ;;  %405 = vst [vmem:[%s999_s20 + $0xd0] sm:$0xff] %v280_v27 }
  0xf2   : > { %v313_v28 = vpop.trf.xlu1  ;;  %v281_v29 = vpop.trf.xlu0 }
  0xf3   : > { %439 = vst [vmem:[%s999_s20 + $0x1e0] sm:$0xff] %v313_v28  ;;  %407 = vst [vmem:[%s999_s20 + $0xe0] sm:$0xff] %v281_v29 }
  0xf6   : > { %v314_v30 = vpop.trf.xlu1  ;;  %v282_v31 = vpop.trf.xlu0 }
  0xf7   : > { %441 = vst [vmem:[%s999_s20 + $0x1f0] sm:$0xff] %v314_v30  ;;  %409 = vst [vmem:[%s999_s20 + $0xf0] sm:$0xff] %v282_v31 }
  0xfa   : > { %v363_v32 = vpop.trf.xlu1  ;;  %v331_v33 = vpop.trf.xlu0 }
  0xfb   : > { %412 = vst [vmem:[%s999_s20 + $0x108] sm:$0xff] %v363_v32  ;;  %380 = vst [vmem:[%s999_s20 + $0x8] sm:$0xff] %v331_v33 }
  0xfe   : > { %v364_v34 = vpop.trf.xlu1  ;;  %v332_v35 = vpop.trf.xlu0 }
  0xff   : > { %414 = vst [vmem:[%s999_s20 + $0x118] sm:$0xff] %v364_v34  ;;  %382 = vst [vmem:[%s999_s20 + $0x18] sm:$0xff] %v332_v35 }
 0x102   : > { %v365_v36 = vpop.trf.xlu1  ;;  %v333_v37 = vpop.trf.xlu0 }
 0x103   : > { %416 = vst [vmem:[%s999_s20 + $0x128] sm:$0xff] %v365_v36  ;;  %384 = vst [vmem:[%s999_s20 + $0x28] sm:$0xff] %v333_v37 }
 0x106   : > { %v366_v38 = vpop.trf.xlu1  ;;  %v334_v39 = vpop.trf.xlu0 }
 0x107   : > { %418 = vst [vmem:[%s999_s20 + $0x138] sm:$0xff] %v366_v38  ;;  %386 = vst [vmem:[%s999_s20 + $0x38] sm:$0xff] %v334_v39 }
 0x10a   : > { %v367_v40 = vpop.trf.xlu1  ;;  %v335_v41 = vpop.trf.xlu0 }
 0x10b   : > { %420 = vst [vmem:[%s999_s20 + $0x148] sm:$0xff] %v367_v40  ;;  %388 = vst [vmem:[%s999_s20 + $0x48] sm:$0xff] %v335_v41 }
 0x10e   : > { %v368_v42 = vpop.trf.xlu1  ;;  %v336_v43 = vpop.trf.xlu0 }
 0x10f   : > { %422 = vst [vmem:[%s999_s20 + $0x158] sm:$0xff] %v368_v42  ;;  %390 = vst [vmem:[%s999_s20 + $0x58] sm:$0xff] %v336_v43 }
 0x112   : > { %v369_v44 = vpop.trf.xlu1  ;;  %v337_v45 = vpop.trf.xlu0 }
 0x113   : > { %424 = vst [vmem:[%s999_s20 + $0x168] sm:$0xff] %v369_v44  ;;  %392 = vst [vmem:[%s999_s20 + $0x68] sm:$0xff] %v337_v45 }
 0x116   : > { %v370_v46 = vpop.trf.xlu1  ;;  %v338_v47 = vpop.trf.xlu0 }
 0x117   : > { %426 = vst [vmem:[%s999_s20 + $0x178] sm:$0xff] %v370_v46  ;;  %394 = vst [vmem:[%s999_s20 + $0x78] sm:$0xff] %v338_v47 }
 0x11a   : > { %v371_v48 = vpop.trf.xlu1  ;;  %v339_v49 = vpop.trf.xlu0 }
 0x11b   : > { %428 = vst [vmem:[%s999_s20 + $0x188] sm:$0xff] %v371_v48  ;;  %396 = vst [vmem:[%s999_s20 + $0x88] sm:$0xff] %v339_v49 }
 0x11e   : > { %v372_v50 = vpop.trf.xlu1  ;;  %v340_v51 = vpop.trf.xlu0 }
 0x11f   : > { %430 = vst [vmem:[%s999_s20 + $0x198] sm:$0xff] %v372_v50  ;;  %398 = vst [vmem:[%s999_s20 + $0x98] sm:$0xff] %v340_v51 }
 0x122   : > { %v373_v52 = vpop.trf.xlu1  ;;  %v341_v53 = vpop.trf.xlu0 }
 0x123   : > { %432 = vst [vmem:[%s999_s20 + $0x1a8] sm:$0xff] %v373_v52  ;;  %400 = vst [vmem:[%s999_s20 + $0xa8] sm:$0xff] %v341_v53 }
 0x126   : > { %v374_v54 = vpop.trf.xlu1  ;;  %v342_v55 = vpop.trf.xlu0 }
 0x127   : > { %434 = vst [vmem:[%s999_s20 + $0x1b8] sm:$0xff] %v374_v54  ;;  %402 = vst [vmem:[%s999_s20 + $0xb8] sm:$0xff] %v342_v55 }
 0x12a   : > { %v375_v56 = vpop.trf.xlu1  ;;  %v343_v57 = vpop.trf.xlu0 }
 0x12b   : > { %436 = vst [vmem:[%s999_s20 + $0x1c8] sm:$0xff] %v375_v56  ;;  %404 = vst [vmem:[%s999_s20 + $0xc8] sm:$0xff] %v343_v57 }
 0x12e   : > { %v376_v58 = vpop.trf.xlu1  ;;  %v344_v59 = vpop.trf.xlu0 }
 0x12f   : > { %438 = vst [vmem:[%s999_s20 + $0x1d8] sm:$0xff] %v376_v58  ;;  %406 = vst [vmem:[%s999_s20 + $0xd8] sm:$0xff] %v344_v59 }
 0x132   : > { %v377_v60 = vpop.trf.xlu1  ;;  %v345_v61 = vpop.trf.xlu0 }
 0x133   : > { %440 = vst [vmem:[%s999_s20 + $0x1e8] sm:$0xff] %v377_v60  ;;  %408 = vst [vmem:[%s999_s20 + $0xe8] sm:$0xff] %v345_v61  ;;  %450 = sbr.rel (!%p877_p9) target bundleno = 341 (0x155), region = 32 }
 0x136   : > { %v378_v62 = vpop.trf.xlu1  ;;  %v346_v63 = vpop.trf.xlu0 }
 0x137   : > { %442 = vst [vmem:[%s999_s20 + $0x1f8] sm:$0xff] %v378_v62  ;;  %410 = vst [vmem:[%s999_s20 + $0xf8] sm:$0xff] %v346_v63 }
 0x138   : > { %s1166_s15 = smov (!%p454_p8, %s453_s15), 32 }
 0x139   : > { %s1069_s18 = sshll.u32 %s1166_s15, 8 }
 0x13a   : > { %s459_s19 = ssub.s32 8192, %s1069_s18 }
 0x13b   : > { %460 = vsyncadd %s444_s2, %s459_s19  ;;  %p585_p1 = scmp.ne.s32.totalorder %s1069_s18, 0  ;;  %s595_s21 = sshll.u32 %s779_s9, 6 }
 0x13c   : > { %s597_s22 = smul.u32 96, %s783_s10  ;;  %s469_s23 = sshll.u32 %s999_s20, 4  ;;  %s1078_s23 = int_to_ptr.vmem [resolvable:$true] %s469_s23 }
 0x13d   : > { %s699_s30 = scalar_lea.vmem %s1078_s23, %s1069_s18  ;;  %s800_s9 = smov [#allocation5]  }
 0x13e   : > { %s465_s24 = sadd.s32 %s597_s22, %s595_s21  ;;  %p700_p9 = scmp.ne.s32.totalorder %s1078_s23, %s699_s30 }
 0x13f   : > { %s587_s27 = sshll.u32 %s465_s24, 7  ;;  %s703_s10 = sshll.u32 %s800_s9, 4  ;;  %s704_s10 = int_to_ptr.vmem [resolvable:$false] %s703_s10 }
 0x140   : > { %s1083_s28 = scalar_lea.hbm %s1139_s1, %s587_s27  ;;  %p701_p2 = pnand %p700_p9, %p585_p1 }
 0x141   : > { %s705_s17 = scalar_lea.vmem %s704_s10, 16384  ;;  %p706_p4 = scmp.lt.s32.totalorder %s1078_s23, %s704_s10 }
 0x142   : > { %p702_p3 = pneg %p701_p2  ;;  %p707_p5 = scmp.lt.s32.totalorder %s705_s17, %s699_s30 }
 0x144   : > { %p708_p6 = por %p707_p5, %p706_p4 }
 0x146   : > { %p709_p7 = pnand %p708_p6, %p702_p3 }
 0x148   : > { %712 = shalt.err (!%p709_p7)
}
 0x149   : > { %s713_s5 = scalar_lea.hbm %s1083_s28, %s1069_s18  ;;  %s717_s4 = scalar_lea.hbm %s1139_s1, 24576 }
 0x14a   : > { %p714_p10 = scmp.ne.s32.totalorder %s1083_s28, %s713_s5  ;;  %p718_p0 = scmp.lt.s32.totalorder %s1083_s28, %s1139_s1 }
 0x14b   : > { %p719_p8 = scmp.lt.s32.totalorder %s717_s4, %s713_s5 }
 0x14c   : > { %p715_p11 = pnand %p714_p10, %p585_p1 }
 0x14d   : > { %p720_p9 = por %p719_p8, %p718_p0 }
 0x14e   : > { %p716_p13 = pneg %p715_p11 }
 0x150   : > { %p721_p2 = pnand %p720_p9, %p716_p13 }
 0x152   : > { %724 = shalt.err (!%p721_p2)
}
 0x153   : > { %s801_s21 = smov 256   ;;  %s802_s22 = smov 16  }
 0x154   : > { %475 = dma.vmem_to_hbm [thread:$0]  (%p585_p1), %s1078_s23, %s1069_s18, %s1083_s28, %s444_s2, %s801_s21, %s801_s21, %s802_s22  }
 0x155 PF: > { %p604_p3 = scmp.ge.s32.totalorder %s795_s13, 2  ;;  %s484_s24 = sand.u32 1, %s767_s6  }
 0x156   : > { %s485_s27 = scalar_lea.sflag [#allocation4], %s484_s24 }
 0x157   : > { %p601_p4 = pnand %p604_p3, %p884_p12 }
 0x159   : > { %p602_p5 = pneg %p601_p4 }
 0x15b   : > { %762 = dma.done.wait (%p602_p5), %s485_s27, 8192  }
 0x15c   : > { %764 = vsyncadd (%p602_p5), %s485_s27, 4294959104  ;;  %s17_s13 = sadd.s32 1, %s795_s13   ;;  %s1148_s16 = sld [smem:[#allocation8_spill]] }
 0x15d   : > { %p14_p6 = scmp.ge.s32.totalorder %s17_s13, 6   ;;  %s1149_s2 = sld [smem:[#allocation9_spill]] }
 0x15e   : > { %s1150_s6 = smov %s771_s7  ;;  %s1151_s7 = smov %s775_s8 }
 0x15f   : > { %s1152_s8 = smov %s889_s26  ;;  %s1153_s9 = smov %s787_s11 }
 0x160   : > { %s1154_s10 = smov %s791_s12  ;;  %16 = sbr.rel (!%p14_p6) target bundleno = 7 (0x7), region = 69 }
 0x162   : > { %s1155_s11 = smov %s1148_s16 }
 0x163   : > { %s1156_s12 = smov %s1149_s2 }
 0x165   :  { %490 = vsyncpa [#allocation3], 1 }
 0x166   :  { %492 = vsyncpa [#allocation3 + $0x1], 1 }
 0x167   :  { %493 = vsyncpa [#allocation4], 1 }
 0x168   :  { %495 = vsyncpa [#allocation4 + $0x1], 1 }

</bundles_post_ra>
